<compile_context>
chip_gen: v6e
topology: v6e:2x2x1
jax: 0.10.0
libtpu: 0.0.40
codegen_flags: <defaults>
</compile_context>

<pallas_src>
import math
import jax
import jax.numpy as jnp
from jax.experimental import pallas as pl
from jax.experimental.pallas import tpu as pltpu

_MIB = 2 ** 20


def _vmem_budget_bytes():
    """Usable per-core VMEM budget (leaves headroom for compiler scratch)."""
    try:
        cap = pltpu.get_tpu_info().vmem_capacity_bytes
    except Exception:
        cap = 64 * _MIB            # conservative default: v7x has 64 MiB / TC
    return int(cap * 3 // 4)       # ~48 MiB on v7x, ~96 MiB on v5e/v6e


def _itemsize(dt):
    return jnp.dtype(dt).itemsize


# ----------------------------------------------------------------------------
# Kernels
# ----------------------------------------------------------------------------
def _ffn_resident_kernel(x_ref, w1_ref, b1_ref, w2_ref, b2_ref, o_ref):
    """Weights fully VMEM-resident (constant block index); grid over row tiles."""
    h = jnp.dot(x_ref[...], w1_ref[...], preferred_element_type=jnp.float32)
    h = jnp.maximum(h + b1_ref[...], 0.0)
    # TODO(synk): training-mode dropout (stochastic masking) not implemented;
    # eval-mode dropout is identity.
    o = jnp.dot(h.astype(w2_ref.dtype), w2_ref[...],
                preferred_element_type=jnp.float32)
    o_ref[...] = (o + b2_ref[...]).astype(o_ref.dtype)


def _ffn_streaming_kernel(x_ref, w1_ref, b1_ref, w2_ref, b2_ref, o_ref, acc_ref):
    """Grid = (row tiles, hidden blocks).

    NOTE: the hidden (reduction) axis MUST stay the LAST grid axis -- the
    init/finalize accumulator pattern below silently breaks otherwise.
    """
    f = pl.program_id(1)

    @pl.when(f == 0)
    def _init():
        acc_ref[...] = jnp.zeros_like(acc_ref)

    # fc1 block + ReLU (hidden units are independent -> safe to tile over F).
    h = jnp.dot(x_ref[...], w1_ref[...], preferred_element_type=jnp.float32)
    h = jnp.maximum(h + b1_ref[...], 0.0)                       # (tm, tf)
    # TODO(synk): training-mode dropout not implemented (identity in eval).

    # Partial fc2: accumulate this hidden block's contribution.
    acc_ref[...] += jnp.dot(h.astype(w2_ref.dtype), w2_ref[...],
                            preferred_element_type=jnp.float32)

    @pl.when(f == pl.num_programs(1) - 1)
    def _finalize():
        o_ref[...] = (acc_ref[...] + b2_ref[...]).astype(o_ref.dtype)


# ----------------------------------------------------------------------------
# Host-side glue
# ----------------------------------------------------------------------------
def prepare_params(fc1_w, fc1_b, fc2_w, fc2_b, dtype=None):
    """One-time setup: PyTorch nn.Linear stores (out, in); the kernel wants
    (in, out) weights and 2-D (1, dim) biases.

    Pass dtype=jnp.bfloat16 on v6e/v7x for 2-4x MXU rate and half the weight
    HBM traffic (f32 accumulation keeps accuracy, but bf16 runs will not match
    an f32 reference to 1e-4)."""
    cast = (lambda a: jnp.asarray(a, dtype)) if dtype is not None else jnp.asarray
    return {
        'w1': cast(jnp.asarray(fc1_w).T),                  # (E, F)
        'b1': cast(jnp.asarray(fc1_b).reshape(1, -1)),     # (1, F)
        'w2': cast(jnp.asarray(fc2_w).T),                  # (F, E)
        'b2': cast(jnp.asarray(fc2_b).reshape(1, -1)),     # (1, E)
    }


def feed_forward(x, prepared, *, tm=None, tf=None, mode="auto", vmem_budget=None):
    """x: (B, T, E). prepared: output of prepare_params. Returns (B, T, E).

    For production shapes prefer E % 128 == 0 (lane-dense output stores and a
    full MXU N dimension for fc2)."""
    B, T, E = x.shape
    w1, b1, w2, b2 = prepared['w1'], prepared['b1'], prepared['w2'], prepared['b2']
    F = w1.shape[1]
    M = B * T
    out_dtype = x.dtype

    budget = int(vmem_budget) if vmem_budget else _vmem_budget_bytes()
    headroom = 2 * _MIB
    xb, ob = _itemsize(x.dtype), _itemsize(out_dtype)
    wb, bb = _itemsize(w1.dtype), _itemsize(b1.dtype)

    # Row-tile candidates: big tiles keep fc1/fc2 MXU-bound instead of
    # HBM-bound on weight streaming; cap at 512 on 64 MiB-VMEM parts (v7x).
    big = 512 if budget <= 48 * _MIB else 1024
    tm_candidates = tuple(c for c in (1024, 512, 256, 128, 64, 32, 16, 8) if c <= big)

    # Fully-resident weight footprint (conservative x2 for Pallas buffering).
    resident_weights = 2 * (E * F * wb + F * bb + F * E * wb + E * bb)

    if mode == "auto":
        mode = "resident" if resident_weights <= budget // 2 else "streaming"

    def stream_cost(tm_, tf_):
        tiles = 2 * (tm_ * E * xb + E * tf_ * wb + tf_ * bb
                     + tf_ * E * wb + E * bb + tm_ * E * ob)
        return tiles + tm_ * E * 4 + headroom              # + f32 accumulator

    def resident_cost(tm_):
        tiles = 2 * (tm_ * E * xb + tm_ * E * ob)
        return resident_weights + tiles + tm_ * F * 4 + headroom  # + f32 hidden

    # --- hidden-dim block (streaming mode only) ------------------------------
    if mode == "streaming":
        if tf is None:
            for c in (512, 256, 128):                      # largest first
                if F % c == 0:
                    tf = c
                    break
            else:
                tf = F if F < 128 else (512 if F > 512 else (256 if F > 256 else 128))
        Fp = ((F + tf - 1) // tf) * tf
        if Fp != F:
            # Exact zero-padding of the hidden dim: padded units have zero
            # weight & bias, relu(0) = 0, and the matching W2 rows are zero,
            # so they contribute nothing to the output.
            w1 = jnp.pad(w1, ((0, 0), (0, Fp - F)))
            b1 = jnp.pad(b1, ((0, 0), (0, Fp - F)))
            w2 = jnp.pad(w2, ((0, Fp - F), (0, 0)))
    else:
        tf, Fp = F, F

    # --- row tile -------------------------------------------------------------
    cost = (lambda t: stream_cost(t, tf)) if mode == "streaming" else resident_cost
    if tm is None:
        usable = [c for c in tm_candidates
                  if cost(c) <= budget and c <= max(8, 2 * M)]
        if not usable:
            usable = [tm_candidates[-1]]
        dividing = [c for c in usable if M % c == 0]
        tm = dividing[0] if dividing else usable[0]

    Mp = ((M + tm - 1) // tm) * tm
    x2 = x.reshape(M, E)
    if Mp != M:
        x2 = jnp.pad(x2, ((0, Mp - M), (0, 0)))   # padded rows discarded below
    grid_m = Mp // tm
    # NOTE(v7x): for best balance across the 2 TensorCores the "parallel" axis
    # length grid_m should be even (or >> 2); halve tm / pad M there if needed.

    vmem_limit = int(min(budget, max(cost(tm) + 2 * _MIB, 16 * _MIB)))

    if mode == "resident":
        out2 = pl.pallas_call(
            _ffn_resident_kernel,
            out_shape=jax.ShapeDtypeStruct((Mp, E), out_dtype),
            grid_spec=pltpu.PrefetchScalarGridSpec(
                num_scalar_prefetch=0,
                grid=(grid_m,),
                in_specs=[
                    pl.BlockSpec((tm, E), lambda m: (m, 0)),   # x row tile
                    pl.BlockSpec((E, F),  lambda m: (0, 0)),   # W1 (DMA'd once)
                    pl.BlockSpec((1, F),  lambda m: (0, 0)),   # b1 (resident)
                    pl.BlockSpec((F, E),  lambda m: (0, 0)),   # W2 (DMA'd once)
                    pl.BlockSpec((1, E),  lambda m: (0, 0)),   # b2 (resident)
                ],
                out_specs=pl.BlockSpec((tm, E), lambda m: (m, 0)),
            ),
            compiler_params=pltpu.CompilerParams(
                dimension_semantics=("parallel",),
                vmem_limit_bytes=vmem_limit,
            ),
        )(x2, w1, b1, w2, b2)
    else:
        out2 = pl.pallas_call(
            _ffn_streaming_kernel,
            out_shape=jax.ShapeDtypeStruct((Mp, E), out_dtype),
            grid_spec=pltpu.PrefetchScalarGridSpec(
                num_scalar_prefetch=0,
                grid=(grid_m, Fp // tf),              # reduction (hidden) axis LAST
                in_specs=[
                    pl.BlockSpec((tm, E), lambda m, f: (m, 0)),   # x row tile
                    pl.BlockSpec((E, tf), lambda m, f: (0, f)),   # W1 column block
                    pl.BlockSpec((1, tf), lambda m, f: (0, f)),   # b1 block
                    pl.BlockSpec((tf, E), lambda m, f: (f, 0)),   # W2 row block
                    pl.BlockSpec((1, E),  lambda m, f: (0, 0)),   # b2 (resident)
                ],
                out_specs=pl.BlockSpec((tm, E), lambda m, f: (m, 0)),
                scratch_shapes=[pltpu.VMEM((tm, E), jnp.float32)],
            ),
            compiler_params=pltpu.CompilerParams(
                dimension_semantics=("parallel", "arbitrary"),
                vmem_limit_bytes=vmem_limit,
            ),
        )(x2, w1, b1, w2, b2)

    return out2[:M].reshape(B, T, E)


def _reference(x, fc1_w, fc1_b, fc2_w, fc2_b):
    """Pure-JAX mirror of the PyTorch forward (dropout = identity)."""
    h = jnp.maximum(x @ fc1_w.T + fc1_b, 0.0)
    return h @ fc2_w.T + fc2_b


if __name__ == "__main__":
    B, T, E, F = 2, 8, 32, 512   # small demo shapes consistent with the module

    key = jax.random.PRNGKey(0)
    k1, k2, k3, k4, k5 = jax.random.split(key, 5)
    s1 = 1.0 / math.sqrt(E)      # nn.Linear default init bound (fan_in = E)
    s2 = 1.0 / math.sqrt(F)      # fan_in = F
    fc1_w = jax.random.uniform(k1, (F, E), jnp.float32, -s1, s1)
    fc1_b = jax.random.uniform(k2, (F,),   jnp.float32, -s1, s1)
    fc2_w = jax.random.uniform(k3, (E, F), jnp.float32, -s2, s2)
    fc2_b = jax.random.uniform(k4, (E,),   jnp.float32, -s2, s2)
    x = jax.random.normal(k5, (B, T, E), jnp.float32)

    prepared = prepare_params(fc1_w, fc1_b, fc2_w, fc2_b)
    ref = _reference(x, fc1_w, fc1_b, fc2_w, fc2_b)

    # 1) Default path: weights fit -> fully VMEM-resident, grid over row tiles.
    out_res = jax.block_until_ready(feed_forward(x, prepared))
    assert out_res.shape == (B, T, E)
    assert jnp.allclose(out_res, ref, atol=1e-4, rtol=1e-4), "resident mismatch"

    # 2) Streaming path (forced): multi-step hidden-dim accumulation,
    #    (2, 4) grid at these shapes -> exercises init/accumulate/finalize.
    out_str = jax.block_until_ready(
        feed_forward(x, prepared, tm=8, tf=128, mode="streaming"))
    assert jnp.allclose(out_str, ref, atol=1e-4, rtol=1e-4), "streaming mismatch"

    # 3) Awkward token count -> exercises the row-padding / tail-slicing path.
    x_odd = x[:, :7, :]
    ref_odd = _reference(x_odd, fc1_w, fc1_b, fc2_w, fc2_b)
    out_odd = jax.block_until_ready(feed_forward(x_odd, prepared))
    assert out_odd.shape == (B, 7, E)
    assert jnp.allclose(out_odd, ref_odd, atol=1e-4, rtol=1e-4), "padded mismatch"

    print("KERNEL_OK")
</pallas_src>

<mosaic_0001>
module attributes {stable_mosaic.version = 11 : i64} {
  func.func @_ffn_resident_kernel(%arg0: i32, %arg1: memref<16x32xf32, #tpu.memory_space<vmem>>, %arg2: memref<32x512xf32, #tpu.memory_space<vmem>>, %arg3: memref<1x512xf32, #tpu.memory_space<vmem>>, %arg4: memref<512x32xf32, #tpu.memory_space<vmem>>, %arg5: memref<1x32xf32, #tpu.memory_space<vmem>>, %arg6: memref<16x32xf32, #tpu.memory_space<vmem>>) attributes {dimension_semantics = [#tpu.dimension_semantics<parallel>], iteration_bounds = array<i64: 1>, scalar_prefetch = 0 : i64, scratch_operands = 0 : i64, tpu.core_type = #tpu.core_type<tc>, window_params = [{transform_indices = @transform_0, window_bounds = array<i64: 16, 32>}, {pipeline_mode = #tpu.pipeline_mode<synchronous>, transform_indices = @transform_1, window_bounds = array<i64: 32, 512>}, {pipeline_mode = #tpu.pipeline_mode<synchronous>, transform_indices = @transform_2, window_bounds = array<i64: 1, 512>}, {pipeline_mode = #tpu.pipeline_mode<synchronous>, transform_indices = @transform_3, window_bounds = array<i64: 512, 32>}, {pipeline_mode = #tpu.pipeline_mode<synchronous>, transform_indices = @transform_4, window_bounds = array<i64: 1, 32>}, {transform_indices = @transform_5, window_bounds = array<i64: 16, 32>}]} {
    %c0 = arith.constant 0 : index
    %c0_0 = arith.constant 0 : index
    %0 = vector.load %arg1[%c0, %c0_0] : memref<16x32xf32, #tpu.memory_space<vmem>>, vector<16x32xf32>
    %c0_1 = arith.constant 0 : index
    %c0_2 = arith.constant 0 : index
    %1 = vector.load %arg2[%c0_1, %c0_2] : memref<32x512xf32, #tpu.memory_space<vmem>>, vector<32x512xf32>
    %cst = arith.constant dense<0.000000e+00> : vector<16x512xf32>
    %2 = tpu.matmul %0, %1, %cst {dimension_numbers = #tpu.dot_dimension_numbers<[1], [0], [0], [1], [0, 0, 1, 1], [], []>} : vector<16x32xf32>, vector<32x512xf32>, vector<16x512xf32> -> vector<16x512xf32>
    %c0_3 = arith.constant 0 : index
    %c0_4 = arith.constant 0 : index
    %3 = vector.load %arg3[%c0_3, %c0_4] : memref<1x512xf32, #tpu.memory_space<vmem>>, vector<1x512xf32>
    %4 = vector.broadcast %3 : vector<1x512xf32> to vector<16x512xf32>
    %5 = arith.addf %2, %4 : vector<16x512xf32>
    %cst_5 = arith.constant 0.000000e+00 : f32
    %6 = vector.broadcast %cst_5 : f32 to vector<16x512xf32>
    %7 = arith.maximumf %5, %6 : vector<16x512xf32>
    %c0_6 = arith.constant 0 : index
    %c0_7 = arith.constant 0 : index
    %8 = vector.load %arg4[%c0_6, %c0_7] : memref<512x32xf32, #tpu.memory_space<vmem>>, vector<512x32xf32>
    %cst_8 = arith.constant dense<0.000000e+00> : vector<16x32xf32>
    %9 = tpu.matmul %7, %8, %cst_8 {dimension_numbers = #tpu.dot_dimension_numbers<[1], [0], [0], [1], [0, 0, 1, 1], [], []>} : vector<16x512xf32>, vector<512x32xf32>, vector<16x32xf32> -> vector<16x32xf32>
    %c0_9 = arith.constant 0 : index
    %c0_10 = arith.constant 0 : index
    %10 = vector.load %arg5[%c0_9, %c0_10] : memref<1x32xf32, #tpu.memory_space<vmem>>, vector<1x32xf32>
    %11 = vector.broadcast %10 : vector<1x32xf32> to vector<16x32xf32>
    %12 = arith.addf %9, %11 : vector<16x32xf32>
    %c0_11 = arith.constant 0 : index
    %c0_12 = arith.constant 0 : index
    %13 = vector.load %arg6[%c0_11, %c0_12] : memref<16x32xf32, #tpu.memory_space<vmem>>, vector<16x32xf32>
    tpu.vector_store %arg6[%c0_11, %c0_12], %12 {strides = array<i32>} : memref<16x32xf32, #tpu.memory_space<vmem>>, vector<16x32xf32>,
    return
  }
  func.func @transform_0(%arg0: i32) -> (i32, i32) {
    %c0_i32 = arith.constant 0 : i32
    %c0_i32_0 = arith.constant 0 : i32
    return %arg0, %c0_i32 : i32, i32
  }
  func.func @transform_1(%arg0: i32) -> (i32, i32) {
    %c0_i32 = arith.constant 0 : i32
    %c0_i32_0 = arith.constant 0 : i32
    %c0_i32_1 = arith.constant 0 : i32
    return %c0_i32, %c0_i32_0 : i32, i32
  }
  func.func @transform_2(%arg0: i32) -> (i32, i32) {
    %c0_i32 = arith.constant 0 : i32
    %c0_i32_0 = arith.constant 0 : i32
    %c0_i32_1 = arith.constant 0 : i32
    return %c0_i32, %c0_i32_0 : i32, i32
  }
  func.func @transform_3(%arg0: i32) -> (i32, i32) {
    %c0_i32 = arith.constant 0 : i32
    %c0_i32_0 = arith.constant 0 : i32
    %c0_i32_1 = arith.constant 0 : i32
    return %c0_i32, %c0_i32_0 : i32, i32
  }
  func.func @transform_4(%arg0: i32) -> (i32, i32) {
    %c0_i32 = arith.constant 0 : i32
    %c0_i32_0 = arith.constant 0 : i32
    %c0_i32_1 = arith.constant 0 : i32
    return %c0_i32, %c0_i32_0 : i32, i32
  }
  func.func @transform_5(%arg0: i32) -> (i32, i32) {
    %c0_i32 = arith.constant 0 : i32
    %c0_i32_0 = arith.constant 0 : i32
    return %arg0, %c0_i32 : i32, i32
  }
}

</mosaic_0001>

<bundles_post_ra>
// kernel: tpu_custom_call.1
= control target key start
LH: loop header
LB: loop body
LE: loop exit
PB: predicated region body
PF: predicated region fallthrough
CT: control target
= control target key end

     0   :  { %vm61_vm0 = vcmask 261120   ;;  %v576_v17 = vmov 0.0   ;;  %s871_s0 = inlined_call_operand.vmem [shape: f32[16,32], index: 0, kind: input, shape index: {}]   ;;  %s872_s1 = inlined_call_operand.vmem [shape: f32[32,512], index: 1, kind: input, shape index: {}]   ;;  %s873_s2 = inlined_call_operand.vmem [shape: f32[1,512], index: 2, kind: input, shape index: {}]   ;;  %s874_s3 = inlined_call_operand.vmem [shape: f32[512,32], index: 3, kind: input, shape index: {}]   ;;  %s875_s4 = inlined_call_operand.vmem [shape: f32[1,32], index: 4, kind: input, shape index: {}]   ;;  %s876_s5 = inlined_call_operand.hbm [shape: f32[16,32], index: 5, kind: output, shape index: {}]  }
   0x1   :  { %v36_v0 = vld [vmem:[%s872_s1 + $0x68] sm:$0xff]  ;;  %v38_v1 = vld [vmem:[%s872_s1 + $0x78] sm:$0xff]  ;;  %v35_v2 = vld [vmem:[%s872_s1 + $0x60] sm:$0xff]  ;;  %132 = vmatprep.mubr.f32.mxu0 %v576_v17  ;;  %209 = vmatprep.mubr.f32.mxu1 %v576_v17 }
   0x2   :  { %92 = vmatprep.subr.mxu0 %v36_v0  ;;  %169 = vmatprep.subr.mxu1 %v38_v1  ;;  %v37_v3 = vld [vmem:[%s872_s1 + $0x70] sm:$0xff]  ;;  %v32_v4 = vld [vmem:[%s872_s1 + $0x48] sm:$0xff]  ;;  %v34_v5 = vld [vmem:[%s872_s1 + $0x58] sm:$0xff] }
   0x3   :  { %93 = vmatpush1.msra.mxu0 %v35_v2  ;;  %170 = vmatpush1.msra.mxu1 %v37_v3  ;;  %v31_v6 = vld [vmem:[%s872_s1 + $0x40] sm:$0xff]  ;;  %v33_v7 = vld [vmem:[%s872_s1 + $0x50] sm:$0xff]  ;;  %v28_v8 = vld [vmem:[%s872_s1 + $0x28] sm:$0xff] }
   0x4   :  { %94 = vmatprep.subr.mxu0 %v32_v4  ;;  %171 = vmatprep.subr.mxu1 %v34_v5  ;;  %v30_v9 = vld [vmem:[%s872_s1 + $0x38] sm:$0xff]  ;;  %v27_v10 = vld [vmem:[%s872_s1 + $0x20] sm:$0xff]  ;;  %v29_v11 = vld [vmem:[%s872_s1 + $0x30] sm:$0xff] }
   0x5   :  { %95 = vmatpush1.msra.mxu0 %v31_v6  ;;  %172 = vmatpush1.msra.mxu1 %v33_v7  ;;  %v24_v12 = vld [vmem:[%s872_s1 + $0x8] sm:$0xff]  ;;  %v26_v13 = vld [vmem:[%s872_s1 + $0x18] sm:$0xff]  ;;  %v23_v14 = vld [vmem:[%s872_s1] sm:$0xff] }
   0x6   :  { %96 = vmatprep.subr.mxu0 %v28_v8  ;;  %173 = vmatprep.subr.mxu1 %v30_v9  ;;  %v25_v15 = vld [vmem:[%s872_s1 + $0x10] sm:$0xff]  ;;  %v21_v16 = vld [vmem:[%s871_s0] sm:$0xff]  ;;  %v261_v18 = vld [vmem:[%s874_s3 + $0xf8] sm:$0xff] }
   0x7   :  { %97 = vmatpush1.msra.mxu0 %v27_v10  ;;  %174 = vmatpush1.msra.mxu1 %v29_v11  ;;  %v293_v19 = vld [vmem:[%s874_s3 + $0x1f8] sm:$0xff]  ;;  %v22_v22 = vld [vmem:[%s871_s0 + $0x8] sm:$0xff]  ;;  %v260_v23 = vld [vmem:[%s874_s3 + $0xf0] sm:$0xff] }
   0x8   :  { %98 = vmatprep.subr.mxu0 %v24_v12  ;;  %175 = vmatprep.subr.mxu1 %v26_v13  ;;  %v245_v20 = vld [vmem:[%s874_s3 + $0x78] sm:$0xff]  ;;  %v292_v24 = vld [vmem:[%s874_s3 + $0x1f0] sm:$0xff]  ;;  %v259_v27 = vld [vmem:[%s874_s3 + $0xe8] sm:$0xff] }
   0x9   :  { %99 = vmatpush1.msra.mxu0 %v23_v14  ;;  %176 = vmatpush1.msra.mxu1 %v25_v15  ;;  %v277_v21 = vld [vmem:[%s874_s3 + $0x178] sm:$0xff]  ;;  %v244_v25 = vld [vmem:[%s874_s3 + $0x70] sm:$0xff]  ;;  %v291_v28 = vld [vmem:[%s874_s3 + $0x1e8] sm:$0xff] }
   0xa   :  { %469 = vmatmul.mubr.msk.f32.vlgmr.msra.gmra.mxu0 %vm61_vm0, %v21_v16  ;;  %471 = vmatmul.mubr.msk.f32.vlgmr.msra.gmra.mxu1 %vm61_vm0, %v21_v16  ;;  %v276_v26 = vld [vmem:[%s874_s3 + $0x170] sm:$0xff]  ;;  %v243_v29 = vld [vmem:[%s874_s3 + $0x68] sm:$0xff]  ;;  %v258_v31 = vld [vmem:[%s874_s3 + $0xe0] sm:$0xff] }
   0xb   :  { %138 = vmatprep.mubr.f32.mxu0 %v576_v17  ;;  %215 = vmatprep.mubr.f32.mxu1 %v576_v17  ;;  %v275_v30 = vld [vmem:[%s874_s3 + $0x168] sm:$0xff]  ;;  %v290_v32 = vld [vmem:[%s874_s3 + $0x1e0] sm:$0xff]  ;;  %v257_v35 = vld [vmem:[%s874_s3 + $0xd8] sm:$0xff] }
   0xc   :  { %474 = vmatprep.subr.mxu0 %v261_v18  ;;  %512 = vmatprep.subr.mxu1 %v293_v19  ;;  %v242_v33 = vld [vmem:[%s874_s3 + $0x60] sm:$0xff]  ;;  %v289_v36 = vld [vmem:[%s874_s3 + $0x1d8] sm:$0xff]  ;;  %v256_v39 = vld [vmem:[%s874_s3 + $0xd0] sm:$0xff] }
   0xd   :  { %475 = vmatpush3.msra.mxu0 %v245_v20  ;;  %513 = vmatpush3.msra.mxu1 %v277_v21  ;;  %v274_v34 = vld [vmem:[%s874_s3 + $0x160] sm:$0xff]  ;;  %v241_v37 = vld [vmem:[%s874_s3 + $0x58] sm:$0xff]  ;;  %v288_v40 = vld [vmem:[%s874_s3 + $0x1d0] sm:$0xff] }
   0xe   :  { %470 = vmatmul.mubr.msk.f32.gmra.mxu0 %vm61_vm0, %v22_v22  ;;  %472 = vmatmul.mubr.msk.f32.gmra.mxu1 %vm61_vm0, %v22_v22  ;;  %v273_v38 = vld [vmem:[%s874_s3 + $0x158] sm:$0xff]  ;;  %v240_v41 = vld [vmem:[%s874_s3 + $0x50] sm:$0xff]  ;;  %v255_v43 = vld [vmem:[%s874_s3 + $0xc8] sm:$0xff] }
   0xf   :  { %476 = vmatprep.subr.mxu0 %v260_v23  ;;  %514 = vmatprep.subr.mxu1 %v292_v24  ;;  %v272_v42 = vld [vmem:[%s874_s3 + $0x150] sm:$0xff]  ;;  %v287_v44 = vld [vmem:[%s874_s3 + $0x1c8] sm:$0xff] }
  0x10   :  { %477 = vmatpush3.msra.mxu0 %v244_v25  ;;  %515 = vmatpush3.msra.mxu1 %v276_v26 }
  0x11   :  { %478 = vmatprep.subr.mxu0 %v259_v27  ;;  %516 = vmatprep.subr.mxu1 %v291_v28 }
  0x12   :  { %479 = vmatpush3.msra.mxu0 %v243_v29  ;;  %517 = vmatpush3.msra.mxu1 %v275_v30 }
  0x13   :  { %480 = vmatprep.subr.mxu0 %v258_v31  ;;  %518 = vmatprep.subr.mxu1 %v290_v32 }
  0x14   :  { %481 = vmatpush3.msra.mxu0 %v242_v33  ;;  %519 = vmatpush3.msra.mxu1 %v274_v34 }
  0x15   :  { %482 = vmatprep.subr.mxu0 %v257_v35  ;;  %520 = vmatprep.subr.mxu1 %v289_v36 }
  0x16   :  { %483 = vmatpush3.msra.mxu0 %v241_v37  ;;  %521 = vmatpush3.msra.mxu1 %v273_v38 }
  0x17   :  { %10 = vsyncpa [#allocation3], 0  ;;  %484 = vmatprep.subr.mxu0 %v256_v39  ;;  %522 = vmatprep.subr.mxu1 %v288_v40  ;;  %v239_v45 = vld [vmem:[%s874_s3 + $0x48] sm:$0xff]  ;;  %v254_v47 = vld [vmem:[%s874_s3 + $0xc0] sm:$0xff]  ;;  %v41_v19 = vlaneseq  ;;  %s577_s24 = smov [#allocation2]  }
  0x18   :  { %v271_v46 = vld [vmem:[%s874_s3 + $0x148] sm:$0xff]  ;;  %485 = vmatpush3.msra.mxu0 %v240_v41  ;;  %523 = vmatpush3.msra.mxu1 %v272_v42  ;;  %v286_v48 = vld [vmem:[%s874_s3 + $0x1c0] sm:$0xff]  ;;  %v253_v51 = vld [vmem:[%s874_s3 + $0xb8] sm:$0xff]  ;;  %s458_s25 = sshll.u32 %s577_s24, 4  ;;  %s459_s25 = int_to_ptr.vmem [resolvable:$true] %s458_s25 }
  0x19   :  { %486 = vmatprep.subr.mxu0 %v255_v43  ;;  %524 = vmatprep.subr.mxu1 %v287_v44  ;;  %v238_v49 = vld [vmem:[%s874_s3 + $0x40] sm:$0xff]  ;;  %v285_v52 = vld [vmem:[%s874_s3 + $0x1b8] sm:$0xff]  ;;  %v252_v55 = vld [vmem:[%s874_s3 + $0xb0] sm:$0xff]  ;;  %v42_v20 = vshrl.u32 %v41_v19, 7  ;;  %p559_p1 = scmp.lt.s32.totalorder %s459_s25, %s459_s25 }
  0x1a   :  { %v270_v50 = vld [vmem:[%s874_s3 + $0x140] sm:$0xff]  ;;  %487 = vmatpush3.msra.mxu0 %v239_v45  ;;  %525 = vmatpush3.msra.mxu1 %v271_v46  ;;  %v237_v53 = vld [vmem:[%s874_s3 + $0x38] sm:$0xff]  ;;  %v284_v56 = vld [vmem:[%s874_s3 + $0x1b0] sm:$0xff] }
  0x1b   :  { %488 = vmatprep.subr.mxu0 %v254_v47  ;;  %526 = vmatprep.subr.mxu1 %v286_v48  ;;  %v269_v54 = vld [vmem:[%s874_s3 + $0x138] sm:$0xff]  ;;  %v236_v57 = vld [vmem:[%s874_s3 + $0x30] sm:$0xff]  ;;  %v251_v59 = vld [vmem:[%s874_s3 + $0xa8] sm:$0xff]  ;;  %v51_v21 = vsub.s32 2, %v42_v20  ;;  %v43_v22 = vsub.s32 0, %v42_v20  ;;  %v47_v24 = vsub.s32 1, %v42_v20 }
  0x1c   :  { %489 = vmatpush3.msra.mxu0 %v238_v49  ;;  %527 = vmatpush3.msra.mxu1 %v270_v50  ;;  %v268_v58 = vld [vmem:[%s874_s3 + $0x130] sm:$0xff]  ;;  %v283_v60 = vld [vmem:[%s874_s3 + $0x1a8] sm:$0xff]  ;;  %v250_v63 = vld [vmem:[%s874_s3 + $0xa0] sm:$0xff]  ;;  %v55_v25 = vsub.s32 3, %v42_v20 }
  0x1d   :  { %490 = vmatprep.subr.mxu0 %v253_v51  ;;  %528 = vmatprep.subr.mxu1 %v285_v52  ;;  %v235_v61 = vld [vmem:[%s874_s3 + $0x28] sm:$0xff]  ;;  %v282_v0 = vld [vmem:[%s874_s3 + $0x1a0] sm:$0xff]  ;;  %v249_v3 = vld [vmem:[%s874_s3 + $0x98] sm:$0xff] }
  0x1e   :  { %491 = vmatpush3.msra.mxu0 %v237_v53  ;;  %529 = vmatpush3.msra.mxu1 %v269_v54  ;;  %v267_v62 = vld [vmem:[%s874_s3 + $0x128] sm:$0xff]  ;;  %v234_v1 = vld [vmem:[%s874_s3 + $0x20] sm:$0xff]  ;;  %v281_v4 = vld [vmem:[%s874_s3 + $0x198] sm:$0xff] }
  0x1f   :  { %492 = vmatprep.subr.mxu0 %v252_v55  ;;  %530 = vmatprep.subr.mxu1 %v284_v56  ;;  %v266_v2 = vld [vmem:[%s874_s3 + $0x120] sm:$0xff]  ;;  %v233_v5 = vld [vmem:[%s874_s3 + $0x18] sm:$0xff]  ;;  %v248_v7 = vld [vmem:[%s874_s3 + $0x90] sm:$0xff] }
  0x20   :  { %493 = vmatpush3.msra.mxu0 %v236_v57  ;;  %531 = vmatpush3.msra.mxu1 %v268_v58  ;;  %v265_v6 = vld [vmem:[%s874_s3 + $0x118] sm:$0xff]  ;;  %v280_v8 = vld [vmem:[%s874_s3 + $0x190] sm:$0xff]  ;;  %v247_v11 = vld [vmem:[%s874_s3 + $0x88] sm:$0xff] }
  0x21   :  { %494 = vmatprep.subr.mxu0 %v251_v59  ;;  %532 = vmatprep.subr.mxu1 %v283_v60  ;;  %v232_v9 = vld [vmem:[%s874_s3 + $0x10] sm:$0xff]  ;;  %v279_v12 = vld [vmem:[%s874_s3 + $0x188] sm:$0xff]  ;;  %v246_v15 = vld [vmem:[%s874_s3 + $0x80] sm:$0xff] }
  0x22   :  { %495 = vmatpush3.msra.mxu0 %v235_v61  ;;  %533 = vmatpush3.msra.mxu1 %v267_v62  ;;  %v264_v10 = vld [vmem:[%s874_s3 + $0x110] sm:$0xff]  ;;  %v231_v13 = vld [vmem:[%s874_s3 + $0x8] sm:$0xff]  ;;  %v278_v16 = vld [vmem:[%s874_s3 + $0x180] sm:$0xff] }
  0x23   :  { %496 = vmatprep.subr.mxu0 %v250_v63  ;;  %534 = vmatprep.subr.mxu1 %v282_v0  ;;  %v263_v14 = vld [vmem:[%s874_s3 + $0x108] sm:$0xff]  ;;  %v230_v17 = vld [vmem:[%s874_s3] sm:$0xff] }
  0x24   :  { %497 = vmatpush3.msra.mxu0 %v234_v1  ;;  %535 = vmatpush3.msra.mxu1 %v266_v2  ;;  %v262_v18 = vld [vmem:[%s874_s3 + $0x100] sm:$0xff] }
  0x25   :  { %498 = vmatprep.subr.mxu0 %v249_v3  ;;  %536 = vmatprep.subr.mxu1 %v281_v4  ;;  %v39_v23 = vld [vmem:[%s873_s2] sm:$0xf] }
  0x26   :  { %499 = vmatpush3.msra.mxu0 %v233_v5  ;;  %537 = vmatpush3.msra.mxu1 %v265_v6  ;;  %v52_v26 = vrot.slane %v39_v23, %v51_v21  ;;  %v44_v27 = vrot.slane %v39_v23, %v43_v22  ;;  %v48_v28 = vrot.slane %v39_v23, %v47_v24  ;;  %v473_v56 = vld [vmem:[%s875_s4] ss:$0 sm:$0xff]  ;;  %s554_s4 = scalar_lea.vmem %s459_s25, 256 }
  0x27   :  { %500 = vmatprep.subr.mxu0 %v248_v7  ;;  %538 = vmatprep.subr.mxu1 %v280_v8  ;;  %v56_v29 = vrot.slane %v39_v23, %v55_v25  ;;  %p555_p0 = scmp.ne.s32.totalorder %s459_s25, %s554_s4  ;;  %p560_p2 = scmp.lt.s32.totalorder %s554_s4, %s554_s4 }
  0x28   :  { %501 = vmatpush3.msra.mxu0 %v232_v9  ;;  %539 = vmatpush3.msra.mxu1 %v264_v10 }
  0x29   :  { %502 = vmatprep.subr.mxu0 %v247_v11  ;;  %540 = vmatprep.subr.mxu1 %v279_v12  ;;  %p561_p3 = por %p560_p2, %p559_p1 }
  0x2a   :  { %503 = vmatpush3.msra.mxu0 %v231_v13  ;;  %541 = vmatpush3.msra.mxu1 %v263_v14 }
  0x2b   :  { %504 = vmatprep.subr.mxu0 %v246_v15  ;;  %542 = vmatprep.subr.mxu1 %v278_v16  ;;  %p562_p4 = pnand %p561_p3, %p555_p0 }
  0x2c   :  { %505 = vmatpush3.msra.mxu0 %v230_v17  ;;  %543 = vmatpush3.msra.mxu1 %v262_v18 }
  0xca   :  { %v134_v30 = vpop.f32.mrf.mxu0  ;;  %v211_v31 = vpop.f32.mrf.mxu1 }
  0xcb   :  { %v212_v32 = vadd.f32 %v211_v31, %v52_v26  ;;  %v135_v33 = vadd.f32 %v134_v30, %v44_v27 }
  0xcc   :  { %v136_v34 = vpop.f32.mrf.mxu0  ;;  %v213_v35 = vpop.f32.mrf.mxu1 }
  0xcd   :  { %v137_v36 = vadd.f32 %v136_v34, %v48_v28  ;;  %v214_v37 = vadd.f32 %v213_v35, %v56_v29  ;;  %v224_v38 = vmax.f32 %v212_v32, 0.0  ;;  %v222_v44 = vmax.f32 %v135_v33, 0.0 }
  0xce   :  { %v140_v39 = vpop.f32.mrf.mxu0  ;;  %v217_v40 = vpop.f32.mrf.mxu1 }
  0xcf   :  { %v223_v41 = vmax.f32 %v137_v36, 0.0  ;;  %v225_v42 = vmax.f32 %v214_v37, 0.0  ;;  %v218_v43 = vadd.f32 %v217_v40, %v52_v26  ;;  %v141_v45 = vadd.f32 %v140_v39, %v44_v27 }
  0xd0   :  { %v142_v46 = vpop.f32.mrf.mxu0  ;;  %v219_v47 = vpop.f32.mrf.mxu1 }
  0xd1   :  { %v143_v48 = vadd.f32 %v142_v46, %v48_v28  ;;  %v220_v49 = vadd.f32 %v219_v47, %v56_v29  ;;  %365 = vmatprep.mubr.f32.mxu0 %v223_v41  ;;  %440 = vmatprep.mubr.f32.mxu1 %v225_v42  ;;  %v228_v50 = vmax.f32 %v218_v43, 0.0  ;;  %v226_v53 = vmax.f32 %v141_v45, 0.0 }
  0xd2   :  { %366 = vmatmul.mubr.f32.vlgmr.msra.gmra.mxu0 %v222_v44  ;;  %441 = vmatmul.mubr.f32.vlgmr.msra.gmra.mxu1 %v224_v38 }
  0xd3   :  { %v227_v51 = vmax.f32 %v143_v48, 0.0  ;;  %v229_v52 = vmax.f32 %v220_v49, 0.0 }
  0xd5   :  { %370 = vmatprep.mubr.f32.mxu0 %v227_v51  ;;  %445 = vmatprep.mubr.f32.mxu1 %v229_v52 }
  0xd6   :  { %371 = vmatmul.mubr.f32.gmra.mxu0 %v226_v53  ;;  %446 = vmatmul.mubr.f32.gmra.mxu1 %v228_v50 }
 0x192   :  { %v506_v54 = vpop.f32.mrf.mxu0  ;;  %v544_v55 = vpop.f32.mrf.mxu1 }
 0x194   :  { %v507_v57 = vpop.f32.mrf.mxu0  ;;  %v545_v58 = vpop.f32.mrf.mxu1 }
 0x195   :  { %v508_v59 = vadd.f32 %v507_v57, %v506_v54  ;;  %v546_v63 = vadd.f32 %v545_v58, %v544_v55 }
 0x196   :  { %v509_v60 = vpop.f32.mrf.mxu0  ;;  %v547_v61 = vpop.f32.mrf.mxu1 }
 0x197   :  { %v368_v62 = vadd.f32 %v508_v59, %v473_v56 }
 0x198   :  { %v510_v0 = vpop.f32.mrf.mxu0  ;;  %v548_v1 = vpop.f32.mrf.mxu1 }
 0x199   :  { %v443_v2 = vadd.f32 %v546_v63, %v368_v62  ;;  %v511_v3 = vadd.f32 %v510_v0, %v509_v60  ;;  %v549_v5 = vadd.f32 %v548_v1, %v547_v61 }
 0x19b   :  { %451 = vst.msk [vmem:[#allocation2] sm:$0xff] %vm61_vm0, %v443_v2  ;;  %v373_v4 = vadd.f32 %v511_v3, %v473_v56 }
 0x19d   :  { %v448_v6 = vadd.f32 %v549_v5, %v373_v4 }
 0x19f   :  { %452 = vst.msk [vmem:[#allocation2 + $0x8] sm:$0xff] %vm61_vm0, %v448_v6 }
 0x1a0   :  { %565 = shalt.err (!%p562_p4)
}
 0x1a1   :  { %s578_s26 = smov 128   ;;  %s579_s27 = smov 8  }
 0x1a2   :  { %464 = dma.vmem_to_hbm [thread:$0]  %s459_s25, 256, %s876_s5, [#allocation3], %s578_s26, %s578_s26, %s579_s27  }
 0x1a3   :  { %574 = dma.done.wait [#allocation3], 256  }
 0x1a4   :  { %575 = vsyncadd [#allocation3], 4294967040 }
 0x1a5   :  { %468 = vsyncpa [#allocation3], 1 }

</bundles_post_ra>
